<compile_context>
chip_gen: v5e
topology: v5e:2x2
jax: 0.10.0
libtpu: 0.0.40
codegen_flags: <defaults>
</compile_context>

<pallas_src>
import functools
import math

import jax
import jax.numpy as jnp
from jax.experimental import pallas as pl
from jax.experimental.pallas import tpu as pltpu

EPS = 1e-6


def _layer_norm_kernel(x_ref, g_ref, b_ref, o_ref, *, d, eps):
    # x_ref/o_ref: (tile_rows, D)   g_ref/b_ref: (1, D)
    x = x_ref[...].astype(jnp.float32)
    g = g_ref[...].astype(jnp.float32)      # (1, D): sublane broadcast, no relayout
    b = b_ref[...].astype(jnp.float32)

    # Two-pass, row-local statistics (exact torch semantics, unbiased N-1).
    mean = jnp.sum(x, axis=-1, keepdims=True) * (1.0 / d)
    diff = x - mean
    var = jnp.sum(diff * diff, axis=-1, keepdims=True) * (1.0 / (d - 1))
    std = jnp.sqrt(var)

    # Per-row reciprocal on the EUP path (exact) instead of a broadcast divide.
    inv = pl.reciprocal(std + eps, approx=False)

    o_ref[...] = (g * (diff * inv) + b).astype(o_ref.dtype)


def _pick_tile_rows(rows, d, itemsize):
    # Sublane packing per dtype: 8 (f32) / 16 (bf16) / 32 (int8/fp8).
    sub = max(8, 32 // itemsize)
    # ~3 MiB per block -> 2x(in+out) double buffers ~= 12 MiB: fits v5e's
    # 16 MiB scoped-VMEM default and v7x's 32 MiB scoped / 64 MiB physical.
    target_bytes = 3 * 1024 * 1024
    tile = max(sub, (target_bytes // max(1, d * itemsize)) // sub * sub)
    # Keep >= 2 grid blocks when rows allow so the "parallel" grid axis can be
    # sharded across both v7x TensorCores.
    tile = min(tile, max(sub, pl.cdiv(pl.cdiv(rows, 2), sub) * sub))
    # Never bigger than the (sublane-rounded) row count for tiny problems.
    tile = min(tile, max(sub, pl.cdiv(rows, sub) * sub))
    return int(tile)


@functools.partial(jax.jit, static_argnames=("tile_rows",))
def layer_norm_forward(x, a_2, b_2, *, tile_rows=None):
    orig_shape = x.shape
    D = orig_shape[-1]
    if D < 2:
        raise ValueError("LayerNorm with unbiased std requires features >= 2")
    rows = math.prod(orig_shape[:-1]) if len(orig_shape) > 1 else 1

    # Metadata-only reshapes: no extra HBM traffic.
    x2d = x.reshape(rows, D)
    g2d = a_2.reshape(1, D)
    b2d = b_2.reshape(1, D)

    if tile_rows is None:
        tile_rows = _pick_tile_rows(rows, D, jnp.dtype(x.dtype).itemsize)
    grid = (pl.cdiv(rows, tile_rows),)   # partial last block handled by Pallas

    out = pl.pallas_call(
        functools.partial(_layer_norm_kernel, d=D, eps=EPS),
        out_shape=jax.ShapeDtypeStruct((rows, D), x.dtype),
        grid_spec=pltpu.PrefetchScalarGridSpec(
            num_scalar_prefetch=0,
            grid=grid,
            in_specs=[
                pl.BlockSpec((tile_rows, D), lambda i: (i, 0)),
                pl.BlockSpec((1, D), lambda i: (0, 0)),
                pl.BlockSpec((1, D), lambda i: (0, 0)),
            ],
            out_specs=pl.BlockSpec((tile_rows, D), lambda i: (i, 0)),
        ),
        compiler_params=pltpu.CompilerParams(
            dimension_semantics=("parallel",)),
    )(x2d, g2d, b2d)

    return out.reshape(orig_shape)


def _reference_forward(x, a_2, b_2):
    # Pure-JAX reference of the torch LayerNorm above.
    x32 = x.astype(jnp.float32)
    d = x.shape[-1]
    mean = jnp.mean(x32, axis=-1, keepdims=True)
    diff = x32 - mean
    std = jnp.sqrt(jnp.sum(diff * diff, axis=-1, keepdims=True) / (d - 1))
    return a_2 * diff / (std + EPS) + b_2


if __name__ == "__main__":
    key = jax.random.PRNGKey(0)
    k_x, k_g, k_b, k_x2 = jax.random.split(key, 4)

    # Shapes implied by the transformer module: (batch, seq, features).
    B, T, D = 2, 8, 32
    x = jax.random.normal(k_x, (B, T, D), dtype=jnp.float32)
    # Module __init__: a_2 = ones(D), b_2 = zeros(D); perturb so affine matters.
    a_2 = jnp.ones((D,), jnp.float32) + 0.05 * jax.random.normal(
        k_g, (D,), dtype=jnp.float32)
    b_2 = jnp.zeros((D,), jnp.float32) + 0.05 * jax.random.normal(
        k_b, (D,), dtype=jnp.float32)

    out = jax.block_until_ready(layer_norm_forward(x, a_2, b_2))
    ref = _reference_forward(x, a_2, b_2)
    assert out.shape == (B, T, D)
    assert jnp.allclose(out, ref, atol=2e-5, rtol=2e-5), "mismatch vs reference"

    # Second check: lane-dense feature dim (D % 128 == 0), a partial last
    # row-block (rows=21, tile=16), and a non-zero mean offset to exercise
    # the two-pass statistics.
    B2, T2, D2 = 3, 7, 128
    x2 = 3.0 + jax.random.normal(k_x2, (B2, T2, D2), dtype=jnp.float32)
    a2 = jnp.ones((D2,), jnp.float32)
    b2 = jnp.zeros((D2,), jnp.float32)
    out2 = jax.block_until_ready(layer_norm_forward(x2, a2, b2))
    ref2 = _reference_forward(x2, a2, b2)
    assert out2.shape == (B2, T2, D2)
    assert jnp.allclose(out2, ref2, atol=2e-5, rtol=2e-5), "mismatch vs reference (2)"

    print("KERNEL_OK")
</pallas_src>

<mosaic_0001>
module attributes {stable_mosaic.version = 11 : i64} {
  func.func @_layer_norm_kernel(%arg0: i32, %arg1: memref<8x32xf32, #tpu.memory_space<vmem>>, %arg2: memref<1x32xf32, #tpu.memory_space<vmem>>, %arg3: memref<1x32xf32, #tpu.memory_space<vmem>>, %arg4: memref<8x32xf32, #tpu.memory_space<vmem>>) attributes {dimension_semantics = [#tpu.dimension_semantics<parallel>], iteration_bounds = array<i64: 2>, scalar_prefetch = 0 : i64, scratch_operands = 0 : i64, tpu.core_type = #tpu.core_type<tc>, window_params = [{transform_indices = @transform_0, window_bounds = array<i64: 8, 32>}, {pipeline_mode = #tpu.pipeline_mode<synchronous>, transform_indices = @transform_1, window_bounds = array<i64: 1, 32>}, {pipeline_mode = #tpu.pipeline_mode<synchronous>, transform_indices = @transform_2, window_bounds = array<i64: 1, 32>}, {transform_indices = @transform_3, window_bounds = array<i64: 8, 32>}]} {
    %c0 = arith.constant 0 : index
    %c0_0 = arith.constant 0 : index
    %0 = vector.load %arg1[%c0, %c0_0] : memref<8x32xf32, #tpu.memory_space<vmem>>, vector<8x32xf32>
    %c0_1 = arith.constant 0 : index
    %c0_2 = arith.constant 0 : index
    %1 = vector.load %arg2[%c0_1, %c0_2] : memref<1x32xf32, #tpu.memory_space<vmem>>, vector<1x32xf32>
    %c0_3 = arith.constant 0 : index
    %c0_4 = arith.constant 0 : index
    %2 = vector.load %arg3[%c0_3, %c0_4] : memref<1x32xf32, #tpu.memory_space<vmem>>, vector<1x32xf32>
    %cst = arith.constant dense<0.000000e+00> : vector<8xf32>
    %3 = vector.multi_reduction <add>, %0, %cst [1] : vector<8x32xf32> to vector<8xf32>
    %4 = vector.shape_cast %3 : vector<8xf32> to vector<8x1xf32>
    %cst_5 = arith.constant 3.125000e-02 : f32
    %5 = vector.broadcast %cst_5 : f32 to vector<8x1xf32>
    %6 = arith.mulf %4, %5 : vector<8x1xf32>
    %7 = vector.broadcast %6 : vector<8x1xf32> to vector<8x32xf32>
    %8 = arith.subf %0, %7 : vector<8x32xf32>
    %9 = arith.mulf %8, %8 : vector<8x32xf32>
    %cst_6 = arith.constant dense<0.000000e+00> : vector<8xf32>
    %10 = vector.multi_reduction <add>, %9, %cst_6 [1] : vector<8x32xf32> to vector<8xf32>
    %11 = vector.shape_cast %10 : vector<8xf32> to vector<8x1xf32>
    %cst_7 = arith.constant 0.0322580636 : f32
    %12 = vector.broadcast %cst_7 : f32 to vector<8x1xf32>
    %13 = arith.mulf %11, %12 : vector<8x1xf32>
    %14 = math.sqrt %13 : vector<8x1xf32>
    %cst_8 = arith.constant 9.99999997E-7 : f32
    %15 = vector.broadcast %cst_8 : f32 to vector<8x1xf32>
    %16 = arith.addf %14, %15 : vector<8x1xf32>
    %17 = tpu.reciprocal %16 : vector<8x1xf32> -> vector<8x1xf32>
    %18 = vector.broadcast %17 : vector<8x1xf32> to vector<8x32xf32>
    %19 = arith.mulf %8, %18 : vector<8x32xf32>
    %20 = vector.broadcast %1 : vector<1x32xf32> to vector<8x32xf32>
    %21 = arith.mulf %20, %19 : vector<8x32xf32>
    %22 = vector.broadcast %2 : vector<1x32xf32> to vector<8x32xf32>
    %23 = arith.addf %21, %22 : vector<8x32xf32>
    %c0_9 = arith.constant 0 : index
    %c0_10 = arith.constant 0 : index
    %24 = vector.load %arg4[%c0_9, %c0_10] : memref<8x32xf32, #tpu.memory_space<vmem>>, vector<8x32xf32>
    tpu.vector_store %arg4[%c0_9, %c0_10], %23 {strides = array<i32>} : memref<8x32xf32, #tpu.memory_space<vmem>>, vector<8x32xf32>,
    return
  }
  func.func @transform_0(%arg0: i32) -> (i32, i32) {
    %c0_i32 = arith.constant 0 : i32
    %c0_i32_0 = arith.constant 0 : i32
    return %arg0, %c0_i32 : i32, i32
  }
  func.func @transform_1(%arg0: i32) -> (i32, i32) {
    %c0_i32 = arith.constant 0 : i32
    %c0_i32_0 = arith.constant 0 : i32
    %c0_i32_1 = arith.constant 0 : i32
    return %c0_i32, %c0_i32_0 : i32, i32
  }
  func.func @transform_2(%arg0: i32) -> (i32, i32) {
    %c0_i32 = arith.constant 0 : i32
    %c0_i32_0 = arith.constant 0 : i32
    %c0_i32_1 = arith.constant 0 : i32
    return %c0_i32, %c0_i32_0 : i32, i32
  }
  func.func @transform_3(%arg0: i32) -> (i32, i32) {
    %c0_i32 = arith.constant 0 : i32
    %c0_i32_0 = arith.constant 0 : i32
    return %arg0, %c0_i32 : i32, i32
  }
}

</mosaic_0001>

<bundles_post_ra>
// kernel: layer_norm_forward.1
= control target key start
LH: loop header
LB: loop body
LE: loop exit
PB: predicated region body
PF: predicated region fallthrough
CT: control target
= control target key end

     0   :  { %8 = vsyncpa [#allocation3], 0  ;;  %s647_s0 = inlined_call_operand.hbm [shape: f32[16,32], index: 0, kind: input, shape index: {}]   ;;  %s648_s1 = inlined_call_operand.vmem [shape: f32[1,32], index: 1, kind: input, shape index: {}]   ;;  %s649_s2 = inlined_call_operand.vmem [shape: f32[1,32], index: 2, kind: input, shape index: {}]   ;;  %s650_s3 = inlined_call_operand.hbm [shape: f32[16,32], index: 3, kind: output, shape index: {}]  }
   0x1   :  { %10 = vsyncpa [#allocation3 + $0x1], 0 }
   0x2   :  { %11 = vsyncpa [#allocation4], 0 }
   0x3   :  { %13 = vsyncpa [#allocation4 + $0x1], 0  ;;  %s507_s12 = smov 0   ;;  %s509_s13 = smov 0  }
   0x4   :  { %s511_s14 = smov 0   ;;  %s513_s15 = smov 0  }
   0x5 LB: > { %s528_s16 = sadd.s32 4294967295, %s485_s15   ;;  %s325_s17 = sadd.s32 4294967294, %s485_s15   ;;  %s485_s15 = sphi %s513_s15, %s660_s15   ;;  %s481_s14 = sphi %s511_s14, %s659_s14   ;;  %s477_s13 = sphi %s509_s13, %s658_s13   ;;  %s473_s12 = sphi %s507_s12, %s657_s12  }
   0x6   : > { %s532_s18 = sadd.s32 1, %s485_s15   ;;  %s26_s19 = sadd.s32 1, %s481_s14 }
   0x7   : > { %s23_s20 = ssub.s32 %s485_s15, %s532_s18  ;;  %p33_p0 = scmp.ne.s32.totalorder %s481_s14, %s477_s13 }
   0x8   : > { %p24_p1 = scmp.eq.s32.totalorder %s23_s20, 0  ;;  %p34_p2 = scmp.eq.s32.totalorder %s485_s15, 0 }
   0x9   : > { %p39_p3 = scmp.ne.s32.totalorder %s477_s13, %s473_s12  ;;  %p40_p4 = scmp.eq.s32.totalorder %s528_s16, 0 }
   0xa   : > { %s544_s21 = scalar_select %p24_p1, %s481_s14, %s26_s19  }
   0xb   : > { %p546_p5 = por %p34_p2, %p33_p0  ;;  %p550_p6 = por %p40_p4, %p39_p3 }
   0xc   : > { %p105_p7 = scmp.eq.s32.totalorder %s528_s16, 1  ;;  %p111_p8 = scmp.eq.s32.totalorder %s325_s17, 1 }
   0xd   : > { %p349_p10 = scmp.lt.s32.totalorder %s485_s15, 2  ;;  %s137_s26 = sand.u32 1, %s481_s14  }
   0xe   : > { %p557_p11 = por %p105_p7, %p33_p0  ;;  %p561_p12 = por %p111_p8, %p39_p3 }
   0xf   : > { %s329_s27 = sshll.u32 %s485_s15, 3  ;;  %s328_s28 = sshll.u32 %s137_s26, 3 }
  0x10   : > { %s145_s4 = scalar_lea.hbm %s647_s0, %s329_s27  ;;  %s141_s6 = scalar_lea.vmem [#allocation2], %s328_s28 }
  0x11   : > { %s147_s5 = sshll.u32 %s145_s4, 4  ;;  %s149_s7 = sshll.u32 %s141_s6, 4  ;;  %s148_s5 = int_to_ptr.hbm [resolvable:$true] %s147_s5  ;;  %s150_s7 = int_to_ptr.vmem [resolvable:$true] %s149_s7 }
  0x12   : > { %p572_p13 = pnand %p349_p10, %p546_p5  ;;  %p330_p0 = scmp.ge.s32.totalorder %s485_s15, 1 }
  0x13   : > { %p154_p1 = scmp.lt.s32.totalorder %s485_s15, 3  ;;  %s138_s9 = scalar_lea.sflag [#allocation3], %s137_s26 }
  0x14   : > { %s389_s10 = sshra.s32 %s148_s5, 4  ;;  %p393_p3 = pneg %p572_p13  ;;  %s390_s10 = int_to_ptr.hbm [resolvable:$true] %s389_s10 }
  0x15   : > { %s391_s11 = scalar_lea.hbm %s390_s10, 8  ;;  %s396_s20 = scalar_lea.hbm %s647_s0, 16 }
  0x16   : > { %p392_p2 = scmp.ne.s32.totalorder %s390_s10, %s391_s11  ;;  %p397_p5 = scmp.lt.s32.totalorder %s390_s10, %s647_s0 }
  0x17   : > { %p398_p8 = scmp.lt.s32.totalorder %s396_s20, %s391_s11 }
  0x18   : > { %p394_p4 = pnand %p393_p3, %p392_p2 }
  0x19   : > { %p399_p10 = por %p398_p8, %p397_p5 }
  0x1a   : > { %p395_p7 = pneg %p394_p4 }
  0x1c   : > { %p400_p9 = pnand %p399_p10, %p395_p7 }
  0x1e   : > { %403 = shalt.err (!%p400_p9)
}
  0x1f   : > { %344 = dma.hbm_to_vmem [thread:$0]  (!%p572_p13), %s148_s5, 128, %s150_s7, %s138_s9  }
  0x20   : > { %p155_p2 = pnand %p330_p0, %p154_p1 }
  0x21   : > { %s593_s26 = sand.u32 (!%p155_p2), 1, %s477_s13  }
  0x22   : > { %158 = sbr.rel (%p155_p2) target bundleno = 332 (0x14c), region = 32  ;;  %s331_s28 = sshll.u32 (!%p155_p2), %s593_s26, 3 }
  0x23   : > { %s161_s29 = scalar_lea.sflag (!%p155_p2), [#allocation3], %s593_s26  ;;  %s164_s30 = scalar_lea.vmem (!%p155_p2), [#allocation2], %s331_s28 }
  0x27   : > { %464 = dma.done.wait (%p550_p6), %s161_s29, 128  }
  0x28   : > { %466 = vsyncadd (%p550_p6), %s161_s29, 4294967168  ;;  %vm191_vm0 = vcmask 261120   ;;  %v188_v0 = vld [vmem:[%s164_s30] sm:$0xff]  ;;  %s334_s23 = sshll.u32 %s528_s16, 3  ;;  %s187_s10 = scalar_lea.vmem [#allocation5], %s331_s28 }
  0x29   : > { %v192_v1 = vsel %vm191_vm0, %v188_v0, 0.0  ;;  %v383_v29 = vld [vmem:[%s648_s1] ss:$0 sm:$0xff]  ;;  %s250_s8 = scalar_lea.hbm %s650_s3, %s334_s23  ;;  %s252_s11 = sshll.u32 %s187_s10, 4  ;;  %s253_s11 = int_to_ptr.vmem [resolvable:$true] %s252_s11 }
  0x2a   : > { %193 = vadd.xlane.f32.xlu0 %v192_v1  ;;  %v384_v32 = vld [vmem:[%s649_s2] ss:$0 sm:$0xff]  ;;  %s254_s17 = sshll.u32 %s250_s8, 4  ;;  %s240_s19 = scalar_lea.sflag [#allocation4], %s593_s26  ;;  %s255_s17 = int_to_ptr.hbm [resolvable:$true] %s254_s17 }
  0x2b   : > { %s433_s20 = sshra.s32 %s255_s17, 4  ;;  %s439_s28 = scalar_lea.hbm %s650_s3, 16  ;;  %s434_s20 = int_to_ptr.hbm [resolvable:$true] %s433_s20 }
  0x2c   : > { %s435_s22 = scalar_lea.hbm %s434_s20, 8  ;;  %p440_p0 = scmp.lt.s32.totalorder %s434_s20, %s650_s3 }
  0x2d   : > { %p436_p6 = scmp.ne.s32.totalorder %s434_s20, %s435_s22  ;;  %p441_p1 = scmp.lt.s32.totalorder %s439_s28, %s435_s22 }
  0x2f   : > { %p437_p9 = pnand %p436_p6, %p557_p11  ;;  %p442_p3 = por %p441_p1, %p440_p0 }
  0x31   : > { %p438_p13 = pneg %p437_p9 }
  0x33   : > { %p443_p4 = pnand %p442_p3, %p438_p13 }
  0x9d   : > { %v194_v2 = vpop.xlane.xlu0 %193 }
  0x9e   : > { %v195_v3 = vmul.f32 0.03125, %v194_v2 }
  0xa0   : > { %v196_v4 = vsub.f32 %v188_v0, %v195_v3 }
  0xa2   : > { %v197_v5 = vmul.f32 %v196_v4, %v196_v4 }
  0xa4   : > { %v198_v6 = vsel %vm191_vm0, %v197_v5, 0.0 }
  0xa5   : > { %199 = vadd.xlane.f32.xlu0 %v198_v6 }
 0x118   : > { %v200_v7 = vpop.xlane.xlu0 %199 }
 0x119   : > { %v201_v8 = vmul.f32 0.032258064, %v200_v7 }
 0x11b   : > { %385 = vrsqrt.f32 %v201_v8  ;;  %vm209_vm1 = vcmp.eq.f32.partialorder %v201_v8, inf  ;;  %v212_v16 = vand.u32 2147483648, %v201_v8  ;;  %vm211_vm2 = vcmp.eq.f32.partialorder %v201_v8, 0.0 }
 0x121   : > { %v386_v9 = vpop.eup %385 }
 0x122   : > { %v203_v10 = vmul.f32 %v386_v9, %v201_v8 }
 0x124   : > { %v204_v11 = vmul.f32 %v386_v9, %v203_v10 }
 0x126   : > { %v205_v12 = vmul.f32 0.5, %v204_v11 }
 0x128   : > { %v206_v13 = vsub.f32 1.5, %v205_v12 }
 0x12a   : > { %v207_v14 = vmul.f32 %v386_v9, %v206_v13 }
 0x12c   : > { %v208_v15 = vmul.f32 %v207_v14, %v201_v8 }
 0x12e   : > { %v210_v17 = vsel %vm209_vm1, %v201_v8, %v208_v15 }
 0x12f   : > { %v213_v18 = vsel %vm211_vm2, %v212_v16, %v210_v17 }
 0x130   : > { %v214_v19 = vadd.f32 1e-06, %v213_v18 }
 0x132   : > { %387 = vrcp.f32 %v214_v19  ;;  %v226_v23 = vand.u32 2147483648, %v214_v19  ;;  %v224_v25 = vand.u32 2147483647, %v214_v19  ;;  %vm220_vm4 = vweird.f32 %v214_v19 }
 0x134   : > { %v227_v27 = vor.u32 1.1754944e-38, %v226_v23  ;;  %vm225_vm6 = vcmp.eq.f32.partialorder %v224_v25, 8.507059e+37 }
 0x138   : > { %v388_v20 = vpop.eup %387 }
 0x139   : > { %v216_v21 = vmul.f32 %v388_v20, %v214_v19  ;;  %vm221_vm3 = vweird.f32 %v388_v20 }
 0x13a   : > { %vm222_vm5 = vmor %vm220_vm4, %vm221_vm3 }
 0x13b   : > { %v217_v22 = vsub.f32 1.0, %v216_v21 }
 0x13d   : > { %v218_v24 = vmul.f32 %v388_v20, %v217_v22 }
 0x13f   : > { %v219_v26 = vadd.f32 %v388_v20, %v218_v24 }
 0x141   : > { %v223_v28 = vsel %vm222_vm5, %v388_v20, %v219_v26 }
 0x142   : > { %v228_v30 = vsel %vm225_vm6, %v227_v27, %v223_v28 }
 0x143   : > { %v229_v31 = vmul.f32 %v228_v30, %v196_v4 }
 0x145   : > { %v233_v33 = vmul.f32 %v383_v29, %v229_v31 }
 0x147   : > { %v237_v34 = vadd.f32 %v384_v32, %v233_v33 }
 0x149   : > { %238 = vst.msk [vmem:[%s187_s10] sm:$0xff] %vm191_vm0, %v237_v34 }
 0x14a   : > { %446 = shalt.err (!%p443_p4)
}
 0x14b   : > { %339 = dma.vmem_to_hbm [thread:$0]  (%p557_p11), %s253_s11, 128, %s255_s17, %s240_s19  }
 0x14c PF: > { %s266_s26 = sand.u32 1, %s473_s12   ;;  %p656_p7 = scmp.ge.s32.totalorder %s485_s15, 2 }
 0x14d   : > { %s267_s4 = scalar_lea.sflag [#allocation4], %s266_s26 }
 0x14e   : > { %p346_p5 = pnand %p656_p7, %p561_p12 }
 0x150   : > { %p347_p8 = pneg %p346_p5 }
 0x152   : > { %468 = dma.done.wait (%p347_p8), %s267_s4, 128  }
 0x153   : > { %470 = vsyncadd (%p347_p8), %s267_s4, 4294967168  ;;  %p16_p10 = scmp.ge.s32.totalorder %s532_s18, 4   ;;  %s657_s12 = smov %s477_s13 }
 0x154   : > { %s658_s13 = smov %s481_s14  ;;  %s659_s14 = smov %s544_s21 }
 0x155   : > { %s660_s15 = smov %s532_s18  ;;  %18 = sbr.rel (!%p16_p10) target bundleno = 5 (0x5), region = 77 }
 0x15a   :  { %273 = vsyncpa [#allocation3], 1 }
 0x15b   :  { %275 = vsyncpa [#allocation3 + $0x1], 1 }
 0x15c   :  { %276 = vsyncpa [#allocation4], 1 }
 0x15d   :  { %278 = vsyncpa [#allocation4 + $0x1], 1 }

</bundles_post_ra>
